<compile_context>
chip_gen: v7x
topology: tpu7x:2x2x1
jax: 0.10.0
libtpu: 0.0.40
codegen_flags: <defaults>
</compile_context>

<pallas_src>
import jax
import jax.numpy as jnp
from jax.experimental import pallas as pl
from jax.experimental.pallas import tpu as pltpu


def _round_up(x: int, m: int) -> int:
    return ((x + m - 1) // m) * m


def _make_bag_loss_kernel(B, N, tile_b, tile_n, n_b, n_n, mask_rows, mask_cols):
    inv_b = float(1.0 / B)  # Python float -> inlined literal, not a captured const.

    def kernel(y_ref, lbl_ref, out_ref, row_min_ref, acc_ref):
        bi = pl.program_id(0)
        ni = pl.program_id(1)

        # Initialize the global sum accumulator once, at the very first step.
        @pl.when((bi == 0) & (ni == 0))
        def _init_acc():
            acc_ref[...] = jnp.zeros((1, 1), jnp.float32)

        # Reset the running per-row min at the start of every N sweep.
        @pl.when(ni == 0)
        def _init_row_min():
            row_min_ref[...] = jnp.full((tile_b, 1), jnp.inf, dtype=jnp.float32)

        y = y_ref[...]  # (tile_b, tile_n), native dtype
        if mask_cols:
            col = (jax.lax.broadcasted_iota(jnp.int32, (tile_b, tile_n), 1)
                   + ni * tile_n)
            y = jnp.where(col < N, y, jnp.asarray(jnp.inf, dtype=y.dtype))

        # Min-reduce in the input dtype; upcast only the (tile_b, 1) result.
        tile_min = jnp.min(y, axis=1, keepdims=True).astype(jnp.float32)
        row_min_ref[...] = jnp.minimum(row_min_ref[...], tile_min)

        # End of an N sweep: squared error vs label, masked sum into acc.
        @pl.when(ni == n_n - 1)
        def _finish_rows():
            lbl = lbl_ref[...].astype(jnp.float32)      # (tile_b, 1)
            d = row_min_ref[...] - lbl
            sq = d * d
            if mask_rows:
                row = (jax.lax.broadcasted_iota(jnp.int32, (tile_b, 1), 0)
                       + bi * tile_b)
                sq = jnp.where(row < B, sq, 0.0)
            acc_ref[...] = acc_ref[...] + jnp.sum(sq, keepdims=True)

        # Final grid step: single write of the mean.
        @pl.when((bi == n_b - 1) & (ni == n_n - 1))
        def _write_out():
            out_ref[...] = acc_ref[...] * inv_b

    return kernel


def bag_loss(y_pred: jax.Array, label: jax.Array, *,
             tile_b: int | None = None, tile_n: int | None = None) -> jax.Array:
    """Pallas equivalent of bagLoss.forward(y_pred, label).

    y_pred: [B, N] float array (any float dtype; streamed in native precision)
    label:  [B]    float array
    returns a scalar float32.
    """
    # TODO(synk): torch.cuda.is_available() host/device shuffling has no kernel
    # equivalent; placement is handled by the JAX runtime.
    B, N = y_pred.shape
    itemsize = jnp.dtype(y_pred.dtype).itemsize

    # Tile sizing: keep the per-buffer y_pred footprint at ~4 MiB so
    # double-buffering fits all generations without raising VMEM limits much.
    if tile_n is None:
        tile_n = min(_round_up(N, 128), 2048)
    if tile_b is None:
        max_rows = max(8, ((4 << 20) // (tile_n * itemsize)) // 8 * 8)
        tile_b = min(_round_up(B, 8), max_rows, 1024)

    B_p = _round_up(B, tile_b)
    N_p = _round_up(N, tile_n)
    n_b = B_p // tile_b
    n_n = N_p // tile_n

    y_p = y_pred
    if (B_p, N_p) != (B, N):
        y_p = jnp.pad(y_pred, ((0, B_p - B), (0, N_p - N)))
    lbl = label.reshape(B, 1)
    if B_p != B:
        lbl = jnp.pad(lbl, ((0, B_p - B), (0, 0)))

    kernel = _make_bag_loss_kernel(
        B, N, tile_b, tile_n, n_b, n_n,
        mask_rows=(B_p != B), mask_cols=(N_p != N))

    tile_bytes = tile_b * tile_n * itemsize
    vmem_limit = int(min(48 << 20, max(16 << 20, 4 * tile_bytes + (2 << 20))))

    cost = pl.CostEstimate(
        flops=2 * B_p * N_p + 3 * B_p,
        transcendentals=0,
        bytes_accessed=B_p * N_p * itemsize
        + B_p * jnp.dtype(lbl.dtype).itemsize + 4,
    )

    out = pl.pallas_call(
        kernel,
        out_shape=jax.ShapeDtypeStruct((1, 1), jnp.float32),
        grid_spec=pltpu.PrefetchScalarGridSpec(
            num_scalar_prefetch=0,
            grid=(n_b, n_n),  # N (row-min reduction) innermost
            in_specs=[
                pl.BlockSpec((tile_b, tile_n), lambda bi, ni: (bi, ni)),
                pl.BlockSpec((tile_b, 1), lambda bi, ni: (bi, 0)),
            ],
            out_specs=pl.BlockSpec((1, 1), lambda bi, ni: (0, 0)),
            scratch_shapes=[
                pltpu.VMEM((tile_b, 1), jnp.float32),  # running per-row min
                pltpu.VMEM((1, 1), jnp.float32),       # global sum accumulator
            ],
        ),
        compiler_params=pltpu.CompilerParams(
            dimension_semantics=("arbitrary", "arbitrary"),
            vmem_limit_bytes=vmem_limit,
        ),
        cost_estimate=cost,
    )(y_p, lbl)
    return out[0, 0]


if __name__ == "__main__":
    key = jax.random.PRNGKey(0)
    k1, k2, k3, k4, k5, k6 = jax.random.split(key, 6)

    def ref_loss(y, lbl):
        return jnp.mean((jnp.min(y.astype(jnp.float32), axis=1)
                         - lbl.astype(jnp.float32)) ** 2)

    # 1) aligned small shapes -> single-tile grid
    y1 = jax.random.normal(k1, (8, 128), dtype=jnp.float32)
    l1 = jax.random.normal(k2, (8,), dtype=jnp.float32)
    out1 = bag_loss(y1, l1)
    jax.block_until_ready(out1)
    assert jnp.allclose(out1, ref_loss(y1, l1), rtol=1e-6, atol=1e-6), (
        out1, ref_loss(y1, l1))

    # 2) non-divisible shapes with forced small tiles -> multi-step grid,
    #    cross-tile min/sum accumulation and row/column masking
    y2 = jax.random.normal(k3, (20, 300), dtype=jnp.float32)
    l2 = jax.random.normal(k4, (20,), dtype=jnp.float32)
    out2 = bag_loss(y2, l2, tile_b=8, tile_n=128)
    jax.block_until_ready(out2)
    assert jnp.allclose(out2, ref_loss(y2, l2), rtol=1e-6, atol=1e-6), (
        out2, ref_loss(y2, l2))

    # 3) bf16 activations streamed in native precision (no wrapper upcast)
    y3 = jax.random.normal(k5, (16, 256), dtype=jnp.bfloat16)
    l3 = jax.random.normal(k6, (16,), dtype=jnp.float32)
    out3 = bag_loss(y3, l3, tile_b=8, tile_n=128)
    jax.block_until_ready(out3)
    assert jnp.allclose(out3, ref_loss(y3, l3), rtol=1e-5, atol=1e-5), (
        out3, ref_loss(y3, l3))

    print("KERNEL_OK")
</pallas_src>

<mosaic_0001>
module attributes {stable_mosaic.version = 11 : i64} {
  func.func @kernel(%arg0: i32, %arg1: i32, %arg2: memref<8x128xf32, #tpu.memory_space<vmem>>, %arg3: memref<8x1xf32, #tpu.memory_space<vmem>>, %arg4: memref<1x1xf32, #tpu.memory_space<vmem>>, %arg5: memref<8x1xf32, #tpu.memory_space<vmem>>, %arg6: memref<1x1xf32, #tpu.memory_space<vmem>>) attributes {dimension_semantics = [#tpu.dimension_semantics<arbitrary>, #tpu.dimension_semantics<arbitrary>], iteration_bounds = array<i64: 1, 1>, scalar_prefetch = 0 : i64, scratch_operands = 2 : i64, tpu.core_type = #tpu.core_type<tc>, window_params = [{transform_indices = @transform_0, window_bounds = array<i64: 8, 128>}, {transform_indices = @transform_1, window_bounds = array<i64: 8, 1>}, {pipeline_mode = #tpu.pipeline_mode<synchronous>, transform_indices = @transform_2, window_bounds = array<i64: 1, 1>}]} {
    %c0_i32 = arith.constant 0 : i32
    %0 = arith.cmpi eq, %arg0, %c0_i32 : i32
    %c0_i32_0 = arith.constant 0 : i32
    %1 = arith.cmpi eq, %arg1, %c0_i32_0 : i32
    %2 = arith.andi %0, %1 : i1
    %3 = arith.extui %2 : i1 to i32
    %c0_i32_1 = arith.constant 0 : i32
    %4 = arith.cmpi ne, %3, %c0_i32_1 : i32
    scf.if %4 {
      %cst_14 = arith.constant 0.000000e+00 : f32
      %22 = vector.broadcast %cst_14 : f32 to vector<1x1xf32>
      %c0_15 = arith.constant 0 : index
      %c0_16 = arith.constant 0 : index
      %23 = vector.load %arg6[%c0_15, %c0_16] : memref<1x1xf32, #tpu.memory_space<vmem>>, vector<1x1xf32>
      tpu.vector_store %arg6[%c0_15, %c0_16], %22 {strides = array<i32>} : memref<1x1xf32, #tpu.memory_space<vmem>>, vector<1x1xf32>,
    } else {
    }
    %c0_i32_2 = arith.constant 0 : i32
    %5 = arith.cmpi eq, %arg1, %c0_i32_2 : i32
    %6 = arith.extui %5 : i1 to i32
    %c0_i32_3 = arith.constant 0 : i32
    %7 = arith.cmpi ne, %6, %c0_i32_3 : i32
    scf.if %7 {
      %cst_14 = arith.constant 0x7F800000 : f32
      %22 = vector.broadcast %cst_14 : f32 to vector<8x1xf32>
      %c0_15 = arith.constant 0 : index
      %c0_16 = arith.constant 0 : index
      %23 = vector.load %arg5[%c0_15, %c0_16] : memref<8x1xf32, #tpu.memory_space<vmem>>, vector<8x1xf32>
      tpu.vector_store %arg5[%c0_15, %c0_16], %22 {strides = array<i32>} : memref<8x1xf32, #tpu.memory_space<vmem>>, vector<8x1xf32>,
    } else {
    }
    %c0 = arith.constant 0 : index
    %c0_4 = arith.constant 0 : index
    %8 = vector.load %arg2[%c0, %c0_4] : memref<8x128xf32, #tpu.memory_space<vmem>>, vector<8x128xf32>
    %cst = arith.constant dense<0x7F800000> : vector<8xf32>
    %9 = vector.multi_reduction <minimumf>, %8, %cst [1] : vector<8x128xf32> to vector<8xf32>
    %10 = vector.shape_cast %9 : vector<8xf32> to vector<8x1xf32>
    %c0_5 = arith.constant 0 : index
    %c0_6 = arith.constant 0 : index
    %11 = vector.load %arg5[%c0_5, %c0_6] : memref<8x1xf32, #tpu.memory_space<vmem>>, vector<8x1xf32>
    %12 = arith.minimumf %11, %10 : vector<8x1xf32>
    %c0_7 = arith.constant 0 : index
    %c0_8 = arith.constant 0 : index
    %13 = vector.load %arg5[%c0_7, %c0_8] : memref<8x1xf32, #tpu.memory_space<vmem>>, vector<8x1xf32>
    tpu.vector_store %arg5[%c0_7, %c0_8], %12 {strides = array<i32>} : memref<8x1xf32, #tpu.memory_space<vmem>>, vector<8x1xf32>,
    %c0_i32_9 = arith.constant 0 : i32
    %14 = arith.cmpi eq, %arg1, %c0_i32_9 : i32
    %15 = arith.extui %14 : i1 to i32
    %c0_i32_10 = arith.constant 0 : i32
    %16 = arith.cmpi ne, %15, %c0_i32_10 : i32
    scf.if %16 {
      %c0_14 = arith.constant 0 : index
      %c0_15 = arith.constant 0 : index
      %22 = vector.load %arg3[%c0_14, %c0_15] : memref<8x1xf32, #tpu.memory_space<vmem>>, vector<8x1xf32>
      %c0_16 = arith.constant 0 : index
      %c0_17 = arith.constant 0 : index
      %23 = vector.load %arg5[%c0_16, %c0_17] : memref<8x1xf32, #tpu.memory_space<vmem>>, vector<8x1xf32>
      %24 = arith.subf %23, %22 : vector<8x1xf32>
      %25 = arith.mulf %24, %24 : vector<8x1xf32>
      %c0_18 = arith.constant 0 : index
      %c0_19 = arith.constant 0 : index
      %26 = vector.load %arg6[%c0_18, %c0_19] : memref<1x1xf32, #tpu.memory_space<vmem>>, vector<1x1xf32>
      %27 = vector.shape_cast %25 : vector<8x1xf32> to vector<1x8x1xf32>
      %cst_20 = arith.constant dense<0.000000e+00> : vector<1xf32>
      %28 = vector.multi_reduction <add>, %27, %cst_20 [1, 2] : vector<1x8x1xf32> to vector<1xf32>
      %29 = vector.shape_cast %28 : vector<1xf32> to vector<1x1x1xf32>
      %30 = vector.extract %29[0, 0, 0] : f32 from vector<1x1x1xf32>
      %31 = vector.broadcast %30 : f32 to vector<1x1xf32>
      %32 = arith.addf %26, %31 : vector<1x1xf32>
      %c0_21 = arith.constant 0 : index
      %c0_22 = arith.constant 0 : index
      %33 = vector.load %arg6[%c0_21, %c0_22] : memref<1x1xf32, #tpu.memory_space<vmem>>, vector<1x1xf32>
      tpu.vector_store %arg6[%c0_21, %c0_22], %32 {strides = array<i32>} : memref<1x1xf32, #tpu.memory_space<vmem>>, vector<1x1xf32>,
    } else {
    }
    %c0_i32_11 = arith.constant 0 : i32
    %17 = arith.cmpi eq, %arg0, %c0_i32_11 : i32
    %c0_i32_12 = arith.constant 0 : i32
    %18 = arith.cmpi eq, %arg1, %c0_i32_12 : i32
    %19 = arith.andi %17, %18 : i1
    %20 = arith.extui %19 : i1 to i32
    %c0_i32_13 = arith.constant 0 : i32
    %21 = arith.cmpi ne, %20, %c0_i32_13 : i32
    scf.if %21 {
      %c0_14 = arith.constant 0 : index
      %c0_15 = arith.constant 0 : index
      %22 = vector.load %arg6[%c0_14, %c0_15] : memref<1x1xf32, #tpu.memory_space<vmem>>, vector<1x1xf32>
      %cst_16 = arith.constant 1.250000e-01 : f32
      %23 = vector.broadcast %cst_16 : f32 to vector<1x1xf32>
      %24 = arith.mulf %22, %23 : vector<1x1xf32>
      %c0_17 = arith.constant 0 : index
      %c0_18 = arith.constant 0 : index
      %25 = vector.load %arg4[%c0_17, %c0_18] : memref<1x1xf32, #tpu.memory_space<vmem>>, vector<1x1xf32>
      tpu.vector_store %arg4[%c0_17, %c0_18], %24 {strides = array<i32>} : memref<1x1xf32, #tpu.memory_space<vmem>>, vector<1x1xf32>,
    } else {
    }
    return
  }
  func.func @transform_0(%arg0: i32, %arg1: i32) -> (i32, i32) {
    %c0_i32 = arith.constant 0 : i32
    return %arg0, %arg1 : i32, i32
  }
  func.func @transform_1(%arg0: i32, %arg1: i32) -> (i32, i32) {
    %c0_i32 = arith.constant 0 : i32
    %c0_i32_0 = arith.constant 0 : i32
    return %arg0, %c0_i32 : i32, i32
  }
  func.func @transform_2(%arg0: i32, %arg1: i32) -> (i32, i32) {
    %c0_i32 = arith.constant 0 : i32
    %c0_i32_0 = arith.constant 0 : i32
    %c0_i32_1 = arith.constant 0 : i32
    return %c0_i32, %c0_i32_0 : i32, i32
  }
}

</mosaic_0001>

<bundles_post_ra>
// kernel: tpu_custom_call.1
= control target key start
LH: loop header
LB: loop body
LE: loop exit
PB: predicated region body
PF: predicated region fallthrough
CT: control target
= control target key end

     0   :  { %s142_s0 = inlined_call_operand.vmem [shape: f32[8,128], index: 0, kind: input, shape index: {}]   ;;  %s143_s1 = inlined_call_operand.vmem [shape: f32[8,1], index: 1, kind: input, shape index: {}]   ;;  %s144_s2 = inlined_call_operand.hbm [shape: f32[1,1], index: 2, kind: output, shape index: {}]  }
   0x1   :  { %v25_v0 = vld [vmem:[%s142_s0] sm:$0xff] }
   0x2   :  { %7 = vsyncpa [#allocation5], 0  ;;  %26 = vmin.xlane.f32.xlu0 %v25_v0  ;;  %vm23_vm0 = vcmask 7168   ;;  %v103_v1 = vmov inf   ;;  %v35_v5 = vld [vmem:[%s143_s1] sm:$0xff]  ;;  %vm18_vm1 = vcmask 0  }
   0x3   :  { %24 = vst.msk [vmem:[#allocation2] sm:$0xff] %vm23_vm0, %v103_v1  ;;  %v104_v10 = vmov 0.0   ;;  %s105_s1 = smov [#allocation4]  }
   0x4   :  { %19 = vst.msk [vmem:[#allocation3] sm:$0x1] %vm18_vm1, %v104_v10  ;;  %s66_s13 = sshll.u32 %s105_s1, 4  ;;  %s67_s13 = int_to_ptr.vmem [resolvable:$true] %s66_s13 }
   0x5   :  { %s79_s14 = scalar_lea.vmem %s67_s13, 16  ;;  %s83_s15 = scalar_lea.vmem %s67_s13, 32 }
   0x6   :  { %p80_p0 = scmp.ne.s32.totalorder %s67_s13, %s79_s14  ;;  %p84_p1 = scmp.lt.s32.totalorder %s67_s13, %s67_s13 }
   0x7   :  { %p85_p2 = scmp.lt.s32.totalorder %s83_s15, %s79_s14 }
   0x9   :  { %p86_p3 = por %p85_p2, %p84_p1 }
   0xa   :  { %v28_v2 = vld [vmem:[#allocation2] sm:$0xff] }
   0xb   :  { %v39_v18 = vld [vmem:[#allocation3] sm:$0x1]  ;;  %p87_p4 = pnand %p86_p3, %p80_p0 }
  0x8f   :  { %v27_v3 = vpop.xlane.xlu0 %26 }
  0x90   :  { %v29_v4 = vmin.f32 %v28_v2, %v27_v3 }
  0x92   :  { %31 = vst.msk [vmem:[#allocation2] sm:$0xff] %vm23_vm0, %v29_v4 }
  0x99   :  { %v36_v6 = vld [vmem:[#allocation2] sm:$0xff] }
  0x9a   :  { %v37_v7 = vsub.f32 %v36_v6, %v35_v5 }
  0x9c   :  { %v38_v8 = vmul.f32 %v37_v7, %v37_v7 }
  0x9e   :  { %v40_v9 = vsel %vm23_vm0, %v38_v8, 0.0 }
  0x9f   :  { %41 = vadd.xlane.f32.xlu0 %v40_v9 }
 0x12c   :  { %v42_v11 = vpop.xlane.xlu0 %41 }
 0x12d   :  { %v43_v12 = vrot.slane %v42_v11, 4 }
 0x12f   :  { %v44_v13 = vadd.f32 %v43_v12, %v42_v11 }
 0x131   :  { %v45_v14 = vrot.slane %v44_v13, 2 }
 0x133   :  { %v46_v15 = vadd.f32 %v45_v14, %v44_v13 }
 0x135   :  { %v47_v16 = vrot.slane %v46_v15, 1 }
 0x137   :  { %v48_v17 = vadd.f32 %v47_v16, %v46_v15 }
 0x139   :  { %74 = vpush %v48_v17 }
 0x16a   :  { %s75_s0 = spop %74 }
 0x16b   :  { %v50_v19 = vstv %s75_s0 }
 0x16c   :  { %v51_v20 = vadd.f32 %v50_v19, %v39_v18 }
 0x16e   :  { %53 = vst.msk [vmem:[#allocation3] sm:$0x1] %vm18_vm1, %v51_v20 }
 0x175   :  { %v56_v21 = vld [vmem:[#allocation3] sm:$0x1] }
 0x176   :  { %v57_v22 = vmul.f32 0.125, %v56_v21 }
 0x178   :  { %59 = vst.msk [vmem:[#allocation4] sm:$0x1] %vm18_vm1, %v57_v22 }
 0x179   :  { %90 = shalt.err (!%p87_p4)
}
 0x17a   :  { %s91_s18 = scalar_lea.hbm %s144_s2, 16 }
 0x17b   :  { %p92_p5 = scmp.ne.s32.totalorder %s144_s2, %s91_s18  ;;  %p95_p6 = scmp.lt.u32.totalorder %s91_s18, %s144_s2 }
 0x17d   :  { %p97_p7 = pnand %p95_p6, %p92_p5 }
 0x17f   :  { %100 = shalt.err (!%p97_p7)
}
 0x180   :  { %69 = dma.vmem_to_hbm [thread:$0]  %s67_s13, 16, %s144_s2, [#allocation5]  }
 0x181   :  { %101 = dma.done.wait [#allocation5], 16  }
 0x182   :  { %102 = vsyncadd [#allocation5], 4294967280 }
 0x183   :  { %73 = vsyncpa [#allocation5], 1 }

</bundles_post_ra>
